<compile_context>
chip_gen: v6e
topology: v6e:2x2x1
jax: 0.10.0
libtpu: 0.0.40
codegen_flags: <defaults>
</compile_context>

<pallas_src>
import jax
import jax.numpy as jnp
from jax import lax
from jax.experimental import pallas as pl
from jax.experimental.pallas import tpu as pltpu


# ----------------------------- kernels ---------------------------------------

def router_kernel_eb(x_ref, w_ref, b_ref, o_ref):
    """Lane-dense path for small E (< 128).

    x_ref: (TB, D), w_ref: (E, D), b_ref: (E, 1), o_ref: (E, TB).
    Logits are computed as (E, TB) so the batch tile (multiple of 128) maps to
    lanes and tiny E maps to sublanes: every VPU/EUP op and the output store
    use full vregs instead of E/128 of a vreg.  Wrapper transposes to (B, E).

    Ragged last batch tile: padded x columns may produce inf/NaN through exp,
    but the softmax here is strictly per-column (per batch element) and
    out-of-range columns are masked on store, so valid columns are unaffected.
    """
    logits = lax.dot_general(
        w_ref[...], x_ref[...],
        dimension_numbers=(((1,), (1,)), ((), ())),      # contract on D
        preferred_element_type=jnp.float32,
    ) + b_ref[...]                                       # (E,1) broadcast over lanes

    # Numerically-stable softmax over experts (axis 0 here == PyTorch dim=1).
    m = jnp.max(logits, axis=0, keepdims=True)           # (1, TB)
    e = jnp.exp(logits - m)                              # EUP
    denom = jnp.sum(e, axis=0, keepdims=True)            # (1, TB)
    # Exact reciprocal: free on an HBM-bound kernel, keeps row sums == 1.
    o_ref[...] = (e * pl.reciprocal(denom, approx=False)).astype(o_ref.dtype)


def router_kernel_be(x_ref, w_ref, b_ref, o_ref):
    """Direct (TB, E) path when E is already lane-dense (E % 128 == 0).

    x_ref: (TB, D), w_ref: (E, D), b_ref: (1, E), o_ref: (TB, E).
    Writes the PyTorch (B, E) layout directly — no wrapper transpose, saving
    an extra HBM read+write pass.
    """
    logits = lax.dot_general(
        x_ref[...], w_ref[...],
        dimension_numbers=(((1,), (1,)), ((), ())),      # contract on D
        preferred_element_type=jnp.float32,
    ) + b_ref[...]

    m = jnp.max(logits, axis=1, keepdims=True)
    e = jnp.exp(logits - m)
    denom = jnp.sum(e, axis=1, keepdims=True)
    o_ref[...] = (e * pl.reciprocal(denom, approx=False)).astype(o_ref.dtype)


# ----------------------------- wrapper ----------------------------------------

# Generation-safe VMEM bookkeeping (perf review):
#   v5e: 16 MiB default scoped / 128 MiB physical
#   v6e: 32 MiB default scoped / 128 MiB physical
#   v7x: 32 MiB default scoped /  64 MiB physical (2 TensorCores)
# Tiles are sized against _TILE_VMEM_BUDGET; the scoped limit is raised to
# _VMEM_LIMIT_BYTES, which fits all three generations with headroom.
_TILE_VMEM_BUDGET = 24 * 1024 * 1024
_VMEM_LIMIT_BYTES = 40 * 1024 * 1024


def _round_down_128(n):
    return (n // 128) * 128


def simple_router_with_glu(x, weight, bias, *, tb=None):
    """x: (B, D); weight: (E, D) (PyTorch layout); bias: (E,). Returns (B, E) f32."""
    B, D = x.shape
    E = weight.shape[0]
    x_item = jnp.dtype(x.dtype).itemsize
    w_item = jnp.dtype(weight.dtype).itemsize
    b_item = jnp.dtype(bias.dtype).itemsize

    # VMEM-layout padded extents: lane dim pads to 128, sublane dim to 8.
    d_pad = -(-D // 128) * 128
    e_pad = -(-E // 8) * 8

    lane_dense_out = (E % 128 == 0)      # can store (B, E) directly

    if tb is None:
        # VMEM-derived batch-tile cap: per grid step we hold two double-buffered
        # x tiles and two double-buffered output tiles, plus the resident weight
        # and bias (budgeted at 2x since we do not rely on single-buffering the
        # constant blocks; their index_map never changes).
        resident = 2 * e_pad * d_pad * w_item + 2 * max(e_pad, 8) * 128 * 4
        per_row = 2 * d_pad * x_item + 2 * e_pad * 4
        tb_cap = max(128, _round_down_128(max(_TILE_VMEM_BUDGET - resident, 0) // per_row))
        # Prefer >= 2 batch tiles so both of v7x's TensorCores get work — a
        # grid of size 1 cannot be sharded by the "parallel" dimension.
        half = max(128, _round_down_128(-(-B // 2)))
        tb = min(tb_cap, half)
        if tb >= B:
            tb = B                       # whole batch in one full-extent tile
    elif tb < B:
        tb = max(128, _round_down_128(tb))
    nb = pl.cdiv(B, tb)
    # TODO(synk): for very large D add a K grid axis ((tb, tk) x blocks,
    # (E, tk) w blocks, (E, tb) f32 accumulator with pl.when init/finalize) so
    # tb stays large without the resident weight blowing the VMEM budget.

    bytes_accessed = B * D * x_item + E * D * w_item + E * b_item + B * E * 4
    if not lane_dense_out:
        bytes_accessed += 2 * B * E * 4  # wrapper transpose re-read/re-write
    cost = pl.CostEstimate(flops=2 * B * D * E, transcendentals=B * E,
                           bytes_accessed=bytes_accessed)

    compiler_params = pltpu.CompilerParams(
        dimension_semantics=("parallel",),      # batch tiles shard across TCs
        vmem_limit_bytes=_VMEM_LIMIT_BYTES,
    )

    if lane_dense_out:
        # E multiple of 128: the (tb, E) store is already lane-dense; write the
        # PyTorch layout directly and skip the wrapper transpose entirely.
        return pl.pallas_call(
            router_kernel_be,
            out_shape=jax.ShapeDtypeStruct((B, E), jnp.float32),
            grid_spec=pltpu.PrefetchScalarGridSpec(
                num_scalar_prefetch=0,
                grid=(nb,),
                in_specs=[
                    pl.BlockSpec((tb, D), lambda i: (i, 0)),   # x tile (pipelined)
                    pl.BlockSpec((E, D), lambda i: (0, 0)),    # weight (resident)
                    pl.BlockSpec((1, E), lambda i: (0, 0)),    # bias (resident)
                ],
                out_specs=pl.BlockSpec((tb, E), lambda i: (i, 0)),
            ),
            compiler_params=compiler_params,
            cost_estimate=cost,
        )(x, weight, bias.reshape(1, E))

    # Small E (< 128): lane-dense (E, B) layout inside the kernel; transpose
    # the tiny (E, B) result back to (B, E) in the wrapper.
    out_eb = pl.pallas_call(
        router_kernel_eb,
        out_shape=jax.ShapeDtypeStruct((E, B), jnp.float32),
        grid_spec=pltpu.PrefetchScalarGridSpec(
            num_scalar_prefetch=0,
            grid=(nb,),
            in_specs=[
                pl.BlockSpec((tb, D), lambda i: (i, 0)),       # x tile (pipelined)
                pl.BlockSpec((E, D), lambda i: (0, 0)),        # weight (resident)
                pl.BlockSpec((E, 1), lambda i: (0, 0)),        # bias (resident)
            ],
            out_specs=pl.BlockSpec((E, tb), lambda i: (0, i)),
        ),
        compiler_params=compiler_params,
        cost_estimate=cost,
    )(x, weight, bias.reshape(E, 1))
    return out_eb.T


# ----------------------------- demo / test ------------------------------------

if __name__ == "__main__":
    # Small shapes consistent with the module: (batch, input_dim) -> (batch, num_experts).
    batch, input_dim, num_experts = 256, 32, 8

    key = jax.random.PRNGKey(0)
    kx, kw, kb = jax.random.split(key, 3)

    x = jax.random.normal(kx, (batch, input_dim), dtype=jnp.float32)

    # Deterministic parameter init mimicking nn.Linear's uniform(-1/sqrt(D), 1/sqrt(D)).
    bound = 1.0 / (input_dim ** 0.5)
    weight = jax.random.uniform(kw, (num_experts, input_dim),
                                minval=-bound, maxval=bound, dtype=jnp.float32)
    bias = jax.random.uniform(kb, (num_experts,),
                              minval=-bound, maxval=bound, dtype=jnp.float32)

    # Auto tile selection -> tb=128, grid=(2,): exercises the pipelined,
    # two-TensorCore-friendly path.
    out = jax.block_until_ready(simple_router_with_glu(x, weight, bias))

    ref = jax.nn.softmax(x @ weight.T + bias, axis=1)
    assert out.shape == (batch, num_experts)
    # Loose-ish tolerance vs the XLA reference (on-device MXU default precision
    # may use bf16 passes for the f32 matmul); row sums are exact softmax.
    assert jnp.allclose(out, ref, atol=2e-3, rtol=2e-3)
    assert jnp.allclose(jnp.sum(out, axis=1), 1.0, atol=1e-4)

    # Also exercise the lane-dense-output path (E % 128 == 0, no transpose).
    E2 = 128
    w2 = jax.random.uniform(kw, (E2, input_dim), minval=-bound, maxval=bound,
                            dtype=jnp.float32)
    b2 = jax.random.uniform(kb, (E2,), minval=-bound, maxval=bound,
                            dtype=jnp.float32)
    out2 = jax.block_until_ready(simple_router_with_glu(x, w2, b2))
    ref2 = jax.nn.softmax(x @ w2.T + b2, axis=1)
    assert out2.shape == (batch, E2)
    assert jnp.allclose(out2, ref2, atol=2e-3, rtol=2e-3)
    assert jnp.allclose(jnp.sum(out2, axis=1), 1.0, atol=1e-4)

    print("KERNEL_OK")
</pallas_src>

<mosaic_0001>
module attributes {stable_mosaic.version = 11 : i64} {
  func.func @router_kernel_eb(%arg0: i32, %arg1: memref<128x32xf32, #tpu.memory_space<vmem>>, %arg2: memref<8x32xf32, #tpu.memory_space<vmem>>, %arg3: memref<8x1xf32, #tpu.memory_space<vmem>>, %arg4: memref<8x128xf32, #tpu.memory_space<vmem>>) attributes {dimension_semantics = [#tpu.dimension_semantics<parallel>], iteration_bounds = array<i64: 2>, scalar_prefetch = 0 : i64, scratch_operands = 0 : i64, tpu.core_type = #tpu.core_type<tc>, window_params = [{transform_indices = @transform_0, window_bounds = array<i64: 128, 32>}, {pipeline_mode = #tpu.pipeline_mode<synchronous>, transform_indices = @transform_1, window_bounds = array<i64: 8, 32>}, {pipeline_mode = #tpu.pipeline_mode<synchronous>, transform_indices = @transform_2, window_bounds = array<i64: 8, 1>}, {transform_indices = @transform_3, window_bounds = array<i64: 8, 128>}]} {
    %c0 = arith.constant 0 : index
    %c0_0 = arith.constant 0 : index
    %0 = vector.load %arg2[%c0, %c0_0] : memref<8x32xf32, #tpu.memory_space<vmem>>, vector<8x32xf32>
    %c0_1 = arith.constant 0 : index
    %c0_2 = arith.constant 0 : index
    %1 = vector.load %arg1[%c0_1, %c0_2] : memref<128x32xf32, #tpu.memory_space<vmem>>, vector<128x32xf32>
    %cst = arith.constant dense<0.000000e+00> : vector<8x128xf32>
    %2 = tpu.matmul %0, %1, %cst {dimension_numbers = #tpu.dot_dimension_numbers<[1], [1], [0], [0], [0, 0, 1, 0], [], []>} : vector<8x32xf32>, vector<128x32xf32>, vector<8x128xf32> -> vector<8x128xf32>
    %c0_3 = arith.constant 0 : index
    %c0_4 = arith.constant 0 : index
    %3 = vector.load %arg3[%c0_3, %c0_4] : memref<8x1xf32, #tpu.memory_space<vmem>>, vector<8x1xf32>
    %4 = vector.broadcast %3 : vector<8x1xf32> to vector<8x128xf32>
    %5 = arith.addf %2, %4 : vector<8x128xf32>
    %cst_5 = arith.constant dense<0xFF800000> : vector<128xf32>
    %6 = vector.multi_reduction <maximumf>, %5, %cst_5 [0] : vector<8x128xf32> to vector<128xf32>
    %7 = vector.shape_cast %6 : vector<128xf32> to vector<1x128xf32>
    %8 = vector.broadcast %7 : vector<1x128xf32> to vector<8x128xf32>
    %9 = arith.subf %5, %8 : vector<8x128xf32>
    %10 = math.exp %9 : vector<8x128xf32>
    %cst_6 = arith.constant dense<0.000000e+00> : vector<128xf32>
    %11 = vector.multi_reduction <add>, %10, %cst_6 [0] : vector<8x128xf32> to vector<128xf32>
    %12 = vector.shape_cast %11 : vector<128xf32> to vector<1x128xf32>
    %13 = tpu.reciprocal %12 : vector<1x128xf32> -> vector<1x128xf32>
    %14 = vector.broadcast %13 : vector<1x128xf32> to vector<8x128xf32>
    %15 = arith.mulf %10, %14 : vector<8x128xf32>
    %c0_7 = arith.constant 0 : index
    %c0_8 = arith.constant 0 : index
    %16 = vector.load %arg4[%c0_7, %c0_8] : memref<8x128xf32, #tpu.memory_space<vmem>>, vector<8x128xf32>
    tpu.vector_store %arg4[%c0_7, %c0_8], %15 {strides = array<i32>} : memref<8x128xf32, #tpu.memory_space<vmem>>, vector<8x128xf32>,
    return
  }
  func.func @transform_0(%arg0: i32) -> (i32, i32) {
    %c0_i32 = arith.constant 0 : i32
    %c0_i32_0 = arith.constant 0 : i32
    return %arg0, %c0_i32 : i32, i32
  }
  func.func @transform_1(%arg0: i32) -> (i32, i32) {
    %c0_i32 = arith.constant 0 : i32
    %c0_i32_0 = arith.constant 0 : i32
    %c0_i32_1 = arith.constant 0 : i32
    return %c0_i32, %c0_i32_0 : i32, i32
  }
  func.func @transform_2(%arg0: i32) -> (i32, i32) {
    %c0_i32 = arith.constant 0 : i32
    %c0_i32_0 = arith.constant 0 : i32
    %c0_i32_1 = arith.constant 0 : i32
    return %c0_i32, %c0_i32_0 : i32, i32
  }
  func.func @transform_3(%arg0: i32) -> (i32, i32) {
    %c0_i32 = arith.constant 0 : i32
    %c0_i32_0 = arith.constant 0 : i32
    return %c0_i32, %arg0 : i32, i32
  }
}

</mosaic_0001>

<bundles_post_ra>
// kernel: tpu_custom_call.1
= control target key start
LH: loop header
LB: loop body
LE: loop exit
PB: predicated region body
PF: predicated region fallthrough
CT: control target
= control target key end

     0   :  { %8 = vsyncpa [#allocation3], 0  ;;  %s747_s0 = inlined_call_operand.vmem [shape: f32[256,32], index: 0, kind: input, shape index: {}]   ;;  %s748_s1 = inlined_call_operand.vmem [shape: f32[8,32], index: 1, kind: input, shape index: {}]   ;;  %s749_s2 = inlined_call_operand.vmem [shape: f32[8,1], index: 2, kind: input, shape index: {}]   ;;  %s750_s3 = inlined_call_operand.hbm [shape: f32[8,256], index: 3, kind: output, shape index: {}]  }
   0x1   :  { %10 = vsyncpa [#allocation3 + $0x1], 0  ;;  %s620_s12 = smov 0   ;;  %s622_s13 = smov 0  }
   0x2   :  { %s624_s14 = smov 0   ;;  %s626_s15 = smov 0  }
   0x3 LB: > { %s641_s16 = sadd.s32 4294967295, %s594_s15   ;;  %s407_s17 = sadd.s32 4294967294, %s594_s15   ;;  %s594_s15 = sphi %s626_s15, %s756_s15   ;;  %s590_s14 = sphi %s624_s14, %s755_s14   ;;  %s586_s13 = sphi %s622_s13, %s754_s13   ;;  %s582_s12 = sphi %s620_s12, %s753_s12  }
   0x4   : > { %s645_s18 = sadd.s32 1, %s594_s15   ;;  %s91_s19 = sadd.s32 1, %s590_s14 }
   0x5   : > { %s88_s20 = ssub.s32 %s594_s15, %s645_s18  ;;  %p101_p0 = scmp.ne.s32.totalorder %s590_s14, %s586_s13 }
   0x6   : > { %p89_p1 = scmp.eq.s32.totalorder %s88_s20, 0  ;;  %p102_p2 = scmp.eq.s32.totalorder %s641_s16, 1 }
   0x7   : > { %p107_p3 = scmp.ne.s32.totalorder %s586_s13, %s582_s12  ;;  %p108_p4 = scmp.eq.s32.totalorder %s407_s17, 1 }
   0x8   : > { %s656_s21 = scalar_select %p89_p1, %s590_s14, %s91_s19  }
   0x9   : > { %p658_p5 = por %p102_p2, %p101_p0  ;;  %p662_p6 = por %p108_p4, %p107_p3 }
   0xa   : > { %p410_p7 = scmp.ge.s32.totalorder %s594_s15, 1  ;;  %p141_p8 = scmp.lt.s32.totalorder %s594_s15, 3 }
   0xc   : > { %p142_p9 = pnand %p410_p7, %p141_p8 }
   0xd   : > { %s412_s24 = sshll.u32 (!%p142_p9), %s641_s16, 4  ;;  %s162_s6 = sand.u32 (!%p142_p9), 1, %s586_s13  }
   0xe   : > { %145 = sbr.rel (%p142_p9) target bundleno = 352 (0x160), region = 32  ;;  %p166_p10 = scmp.lt.s32.totalorder (!%p142_p9), %s412_s24, 31 }
   0xf   : > { %s411_s7 = sshll.u32 (!%p142_p9), %s162_s6, 3  ;;  %s432_s8 = sshll.u32 (!%p142_p9), %s641_s16, 7 }
  0x10   : > { %s164_s9 = scalar_lea.vmem (!%p142_p9), [#allocation2], %s411_s7  ;;  %s346_s19 = scalar_lea.hbm (!%p142_p9), %s750_s3, %s432_s8 }
  0x11   : > { %s348_s10 = sshll.u32 (!%p142_p9), %s164_s9, 4  ;;  %s335_s20 = scalar_lea.sflag (!%p142_p9), [#allocation3], %s162_s6  ;;  %s349_s10 = int_to_ptr.vmem [resolvable:$true] %s348_s10 }
  0x12   : > { %s599_s25 = smov (!%p142_p9), [#allocation2]  }
  0x13   : > { %v596_v0 = vmov 0.0   ;;  %vm597_vm0 = vmmov 0   ;;  %v188_v1 = vld [vmem:[%s749_s2] sm:$0xff]  ;;  %v598_v2 = vmov 0   ;;  %s758_s24 = smov (!%p166_p10, %s412_s24), 31  ;;  %vm194_vm1 = vcmask 261120  }
  0x14   : > { %452 = vmatprep.subr.mxu0 %v596_v0  ;;  %484 = vmatprep.mubr.msk.f32.mxu0 %vm597_vm0, %v596_v0  ;;  %s413_s27 = sshll.u32 %s758_s24, 3  ;;  %v171_v19 = vld [vmem:[%s748_s1] sm:$0xff]  ;;  %s534_s24 = scalar_lea.vmem %s349_s10, 128 }
  0x15   : > { %529 = vset.pattern.permute.xlu0 %v598_v2  ;;  %s675_s30 = scalar_lea.vmem %s747_s0, %s413_s27  ;;  %p535_p11 = scmp.ne.s32.totalorder %s349_s10, %s534_s24 }
  0x16   : > { %191 = vperm.xlu0 %529, %v188_v1   ;;  %v187_v3 = vld [vmem:[%s675_s30 + $0x78] sm:$0xff]  ;;  %v186_v4 = vld [vmem:[%s675_s30 + $0x70] sm:$0xff]  ;;  %v185_v5 = vld [vmem:[%s675_s30 + $0x68] sm:$0xff]  ;;  %s538_s26 = sshll.u32 %s599_s25, 4  ;;  %s539_s26 = int_to_ptr.vmem [resolvable:$false] %s538_s26 }
  0x17   : > { %453 = vmatpush3.xpose.msk.msra.mxu0 %vm194_vm1, %v187_v3  ;;  %v184_v6 = vld [vmem:[%s675_s30 + $0x60] sm:$0xff]  ;;  %v183_v7 = vld [vmem:[%s675_s30 + $0x58] sm:$0xff]  ;;  %v182_v8 = vld [vmem:[%s675_s30 + $0x50] sm:$0xff]  ;;  %p536_p12 = pnand %p535_p11, %p658_p5  ;;  %s540_s16 = scalar_lea.vmem %s539_s26, 256 }
  0x18   : > { %454 = vmatprep.subr.mxu0 %v596_v0  ;;  %v181_v9 = vld [vmem:[%s675_s30 + $0x48] sm:$0xff]  ;;  %v180_v10 = vld [vmem:[%s675_s30 + $0x40] sm:$0xff]  ;;  %v179_v11 = vld [vmem:[%s675_s30 + $0x38] sm:$0xff]  ;;  %p541_p0 = scmp.lt.s32.totalorder %s349_s10, %s539_s26  ;;  %p542_p1 = scmp.lt.s32.totalorder %s540_s16, %s534_s24 }
  0x19   : > { %v178_v12 = vld [vmem:[%s675_s30 + $0x30] sm:$0xff]  ;;  %v177_v13 = vld [vmem:[%s675_s30 + $0x28] sm:$0xff]  ;;  %v176_v14 = vld [vmem:[%s675_s30 + $0x20] sm:$0xff]  ;;  %p537_p13 = pneg %p536_p12 }
  0x1a   : > { %v175_v15 = vld [vmem:[%s675_s30 + $0x18] sm:$0xff]  ;;  %v174_v16 = vld [vmem:[%s675_s30 + $0x10] sm:$0xff]  ;;  %v173_v17 = vld [vmem:[%s675_s30 + $0x8] sm:$0xff]  ;;  %p543_p2 = por %p542_p1, %p541_p0 }
  0x1b   : > { %455 = vmatpush3.xpose.msk.msra.mxu0 %vm194_vm1, %v186_v4  ;;  %v172_v18 = vld [vmem:[%s675_s30] sm:$0xff] }
  0x1c   : > { %456 = vmatprep.subr.mxu0 %v596_v0  ;;  %p544_p3 = pnand %p543_p2, %p537_p13 }
  0x1f   : > { %457 = vmatpush3.xpose.msk.msra.mxu0 %vm194_vm1, %v185_v5 }
  0x20   : > { %458 = vmatprep.subr.mxu0 %v596_v0 }
  0x23   : > { %459 = vmatpush3.xpose.msk.msra.mxu0 %vm194_vm1, %v184_v6 }
  0x24   : > { %460 = vmatprep.subr.mxu0 %v596_v0 }
  0x27   : > { %461 = vmatpush3.xpose.msk.msra.mxu0 %vm194_vm1, %v183_v7 }
  0x28   : > { %462 = vmatprep.subr.mxu0 %v596_v0 }
  0x2b   : > { %463 = vmatpush3.xpose.msk.msra.mxu0 %vm194_vm1, %v182_v8 }
  0x2c   : > { %464 = vmatprep.subr.mxu0 %v596_v0 }
  0x2f   : > { %465 = vmatpush3.xpose.msk.msra.mxu0 %vm194_vm1, %v181_v9 }
  0x30   : > { %466 = vmatprep.subr.mxu0 %v596_v0 }
  0x33   : > { %467 = vmatpush3.xpose.msk.msra.mxu0 %vm194_vm1, %v180_v10 }
  0x34   : > { %468 = vmatprep.subr.mxu0 %v596_v0 }
  0x37   : > { %469 = vmatpush3.xpose.msk.msra.mxu0 %vm194_vm1, %v179_v11 }
  0x38   : > { %470 = vmatprep.subr.mxu0 %v596_v0 }
  0x3b   : > { %471 = vmatpush3.xpose.msk.msra.mxu0 %vm194_vm1, %v178_v12 }
  0x3c   : > { %472 = vmatprep.subr.mxu0 %v596_v0 }
  0x3f   : > { %473 = vmatpush3.xpose.msk.msra.mxu0 %vm194_vm1, %v177_v13 }
  0x40   : > { %474 = vmatprep.subr.mxu0 %v596_v0 }
  0x43   : > { %475 = vmatpush3.xpose.msk.msra.mxu0 %vm194_vm1, %v176_v14 }
  0x44   : > { %476 = vmatprep.subr.mxu0 %v596_v0 }
  0x47   : > { %477 = vmatpush3.xpose.msk.msra.mxu0 %vm194_vm1, %v175_v15 }
  0x48   : > { %478 = vmatprep.subr.mxu0 %v596_v0 }
  0x4b   : > { %479 = vmatpush3.xpose.msk.msra.mxu0 %vm194_vm1, %v174_v16 }
  0x4c   : > { %480 = vmatprep.subr.mxu0 %v596_v0 }
  0x4f   : > { %481 = vmatpush3.xpose.msk.msra.mxu0 %vm194_vm1, %v173_v17 }
  0x50   : > { %482 = vmatprep.subr.mxu0 %v596_v0 }
  0x53   : > { %483 = vmatpush3.xpose.msk.msra.mxu0 %vm194_vm1, %v172_v18 }
  0x56   : > { %485 = vmatmul.mubr.msk.f32.vlgmr.msra.gmra.mxu0 %vm194_vm1, %v171_v19 }
  0x91   : > { %v192_v20 = vpop.permute.xlu0 %191 }
 0x116   : > { %v312_v21 = vpop.f32.mrf.mxu0 }
 0x117   : > { %v313_v22 = vadd.f32 %v312_v21, %v192_v20 }
 0x118   : > { %v486_v23 = vpop.f32.mrf.mxu0 }
 0x119   : > { %v316_v24 = vrot.slane %v313_v22, 4 }
 0x11b   : > { %v317_v25 = vmax.f32 %v313_v22, %v316_v24 }
 0x11d   : > { %v318_v26 = vrot.slane %v317_v25, 2 }
 0x11f   : > { %v319_v27 = vmax.f32 %v317_v25, %v318_v26 }
 0x121   : > { %v320_v28 = vrot.slane %v319_v27, 1 }
 0x123   : > { %v321_v29 = vmax.f32 %v319_v27, %v320_v28 }
 0x125   : > { %v322_v30 = vsub.f32 %v313_v22, %v321_v29 }
 0x127   : > { %v323_v31 = vmul.f32 1.442695, %v322_v30 }
 0x129   : > { %530 = vpow2.f32 %v323_v31 }
 0x136   : > { %v531_v32 = vpop.eup %530 }
 0x137   : > { %v325_v33 = vrot.slane %v531_v32, 4 }
 0x139   : > { %v326_v34 = vadd.f32 %v531_v32, %v325_v33 }
 0x13b   : > { %v327_v35 = vrot.slane %v326_v34, 2 }
 0x13d   : > { %v328_v36 = vadd.f32 %v327_v35, %v326_v34 }
 0x13f   : > { %v329_v37 = vrot.slane %v328_v36, 1 }
 0x141   : > { %v330_v38 = vadd.f32 %v329_v37, %v328_v36 }
 0x143   : > { %532 = vrcp.f32 %v330_v38 }
 0x150   : > { %v533_v39 = vpop.eup %532 }
 0x151   : > { %v332_v40 = vmul.f32 %v533_v39, %v531_v32 }
 0x153   : > { %333 = vst [vmem:[%s164_s9] sm:$0xff] %v332_v40 }
 0x154   : > { %547 = shalt.err (!%p544_p3)
}
 0x155   : > { %s548_s27 = scalar_lea.hbm %s346_s19, 128  ;;  %s552_s30 = scalar_lea.hbm %s750_s3, 256 }
 0x156   : > { %p549_p4 = scmp.ne.s32.totalorder %s346_s19, %s548_s27  ;;  %p553_p9 = scmp.lt.s32.totalorder %s346_s19, %s750_s3 }
 0x157   : > { %p554_p10 = scmp.lt.s32.totalorder %s552_s30, %s548_s27 }
 0x158   : > { %p550_p7 = pnand %p549_p4, %p658_p5 }
 0x159   : > { %p555_p11 = por %p554_p10, %p553_p9 }
 0x15a   : > { %p551_p8 = pneg %p550_p7 }
 0x15c   : > { %p556_p12 = pnand %p555_p11, %p551_p8 }
 0x15e   : > { %559 = shalt.err (!%p556_p12)
}
 0x15f   : > { %487 = dma.vmem_to_hbm [thread:$0]  (%p658_p5), %s349_s10, 128, %s346_s19, %s335_s20  }
 0x160 PF: > { %p493_p13 = scmp.ge.s32.totalorder %s594_s15, 2  ;;  %s360_s6 = sand.u32 1, %s582_s12  }
 0x161   : > { %s361_s7 = scalar_lea.sflag [#allocation3], %s360_s6 }
 0x162   : > { %p490_p0 = pnand %p493_p13, %p662_p6 }
 0x164   : > { %p491_p1 = pneg %p490_p0 }
 0x166   : > { %577 = dma.done.wait (%p491_p1), %s361_s7, 128  }
 0x167   : > { %579 = vsyncadd (%p491_p1), %s361_s7, 4294967168  ;;  %p13_p2 = scmp.ge.s32.totalorder %s645_s18, 4   ;;  %s753_s12 = smov %s586_s13 }
 0x168   : > { %s754_s13 = smov %s590_s14  ;;  %s755_s14 = smov %s656_s21 }
 0x169   : > { %s756_s15 = smov %s645_s18  ;;  %15 = sbr.rel (!%p13_p2) target bundleno = 3 (0x3), region = 67 }
 0x16e   :  { %366 = vsyncpa [#allocation3], 1 }
 0x16f   :  { %368 = vsyncpa [#allocation3 + $0x1], 1 }

</bundles_post_ra>
